<compile_context>
chip_gen: v6e
topology: v6e:2x2x1
jax: 0.10.0
libtpu: 0.0.40
codegen_flags: <defaults>
</compile_context>

<pallas_src>
import functools

import jax
import jax.numpy as jnp
import numpy as np
from jax.experimental import pallas as pl
from jax.experimental.pallas import tpu as pltpu


def _gnn_kernel(residual,
                x_ref, v_ref, e_ref, m_ref,
                w1_ref, b1_ref, w2_ref, b2_ref,
                wsn_ref, bsn_ref, wse_ref, bse_ref,
                out_v_ref, out_e_ref):
    out_dim = out_v_ref.shape[-1]
    x = x_ref[...]                                            # [B*E, d_in]

    # fused node|edge MLP, layer 1 (ReLU, f32 accumulate)      [B*E, 2*out]
    h = jnp.maximum(
        jnp.dot(x, w1_ref[...], preferred_element_type=jnp.float32) + b1_ref[...],
        0.0)
    # fused layer 2 against block-diag(w2n, w2e)               [B*E, 2*out]
    y = jnp.dot(h.astype(w2_ref.dtype), w2_ref[...],
                preferred_element_type=jnp.float32) + b2_ref[...]
    y_node = y[:, :out_dim]                                    # node messages
    upd_e = y[:, out_dim:]                                     # edge update

    # scatter_add over target nodes + degree normalization, as one matmul with
    # the precomputed block-diagonal (I_B kron onehot/deg) matrix.
    upd_v = jnp.dot(m_ref[...], y_node.astype(m_ref.dtype),
                    preferred_element_type=jnp.float32)        # [B*V, out]

    if residual:  # static Python flag, traced once
        upd_v = upd_v + jnp.dot(v_ref[...], wsn_ref[...],
                                preferred_element_type=jnp.float32) + bsn_ref[...]
        upd_e = upd_e + jnp.dot(e_ref[...], wse_ref[...],
                                preferred_element_type=jnp.float32) + bse_ref[...]

    out_v_ref[...] = jnp.maximum(upd_v, 0.0)
    out_e_ref[...] = jnp.maximum(upd_e, 0.0)


def _pick_batch_block(N, V, E, sublane_mult, step_bytes_fn, budget_bytes):
    """Largest divisor B of N whose row blocks stay tile-aligned and fit the VMEM
    budget; prefer keeping >= 2 grid steps so v7x's two TensorCores both work."""
    valid = []
    for b in range(1, N + 1):
        if N % b:
            continue
        aligned = (b == N) or ((b * E) % sublane_mult == 0 and (b * V) % sublane_mult == 0)
        if aligned and step_bytes_fn(b) <= budget_bytes:
            valid.append(b)
    if not valid:           # last resort: whole batch in one step (blocks == full arrays)
        return N
    pref = [b for b in valid if N // b >= 2]
    return max(pref) if pref else max(valid)


def gnn_layer_forward(v, e, G, A, params, *, residual=True,
                      mxu_dtype=jnp.float32, vmem_block_budget_bytes=24 << 20):
    N, V, node_dim = v.shape
    _, E, edge_dim = e.shape
    out_dim = params["w2n"].shape[1]
    d_in = 2 * node_dim + edge_dim
    f32 = jnp.float32
    in_bytes = jnp.dtype(mxu_dtype).itemsize

    # ---- glue (plain JAX): gather endpoints, concat, flatten batch into rows ----
    x = jnp.concatenate([v[:, G[:, 0], :], v[:, G[:, 1], :], e], axis=-1)   # [N,E,d_in]
    x_flat = x.reshape(N * E, d_in).astype(mxu_dtype)
    v_flat = v.reshape(N * V, node_dim).astype(mxu_dtype)
    e_flat = e.reshape(N * E, edge_dim).astype(mxu_dtype)

    # ---- degree-normalized one-hot scatter matrix (degree folded in here) ----
    deg = jnp.maximum(A.astype(f32).sum(axis=0), 1.0)                        # [V]
    M = (G[:, 1][None, :] == jnp.arange(V)[:, None]).astype(f32) / deg[:, None]

    # ---- fused MLP weights: [w1n | w1e], block-diag(w2n, w2e); f32 biases ----
    w1 = jnp.concatenate([params["w1n"], params["w1e"]], axis=1).astype(mxu_dtype)
    b1 = jnp.concatenate([params["b1n"], params["b1e"]], axis=1).astype(f32)
    w2 = jnp.concatenate(
        [jnp.concatenate([params["w2n"], jnp.zeros_like(params["w2n"])], axis=1),
         jnp.concatenate([jnp.zeros_like(params["w2e"]), params["w2e"]], axis=1)],
        axis=0).astype(mxu_dtype)
    b2 = jnp.concatenate([params["b2n"], params["b2e"]], axis=1).astype(f32)

    if residual:
        wsn, bsn = params["wsn"].astype(mxu_dtype), params["bsn"].astype(f32)
        wse, bse = params["wse"].astype(mxu_dtype), params["bse"].astype(f32)
    else:  # unused inside the kernel; keeps the argument list static
        wsn = jnp.zeros((node_dim, out_dim), mxu_dtype)
        bsn = jnp.zeros((1, out_dim), f32)
        wse = jnp.zeros((edge_dim, out_dim), mxu_dtype)
        bse = jnp.zeros((1, out_dim), f32)

    # ---- choose how many graphs to process per grid step ----
    def step_bytes(b):
        blocks = (b * E * d_in + b * V * node_dim + b * E * edge_dim
                  + (b * V) * (b * E)) * in_bytes
        outs = (b * V + b * E) * out_dim * 4
        return 2 * (blocks + outs)           # double-buffered in/out blocks

    sublane_mult = 16 if in_bytes == 2 else 8
    B = _pick_batch_block(N, V, E, sublane_mult, step_bytes, vmem_block_budget_bytes)
    grid = (N // B,)

    # block-diagonal scatter matrix for B graphs: (I_B kron M_norm)  [B*V, B*E]
    # TODO(synk): for large graphs, tile this over E with a reduction grid axis
    # (accumulator + pl.when init/finalize) instead of one dense block — it must
    # fit VMEM and v7x only has 64 MiB.
    M_big = jnp.kron(jnp.eye(B, dtype=f32), M).astype(mxu_dtype)

    weight_bytes = ((w1.size + w2.size + wsn.size + wse.size) * in_bytes
                    + (b1.size + b2.size + bsn.size + bse.size) * 4)
    vmem_limit = int(min(64 << 20, max(16 << 20, 4 * (step_bytes(B) + weight_bytes))))

    full = lambda shape: pl.BlockSpec(shape, lambda n: (0, 0))
    rows = lambda shape: pl.BlockSpec(shape, lambda n: (n, 0))

    grid_spec = pltpu.PrefetchScalarGridSpec(
        num_scalar_prefetch=0,
        grid=grid,
        in_specs=[
            rows((B * E, d_in)),                  # x
            rows((B * V, node_dim)),              # v  (residual shortcut)
            rows((B * E, edge_dim)),              # e  (residual shortcut)
            full((B * V, B * E)),                 # block-diag normalized scatter matrix
            full((d_in, 2 * out_dim)), full((1, 2 * out_dim)),          # fused MLP L1
            full((2 * out_dim, 2 * out_dim)), full((1, 2 * out_dim)),   # fused MLP L2
            full((node_dim, out_dim)), full((1, out_dim)),              # shortcut_node
            full((edge_dim, out_dim)), full((1, out_dim)),              # shortcut_edge
        ],
        out_specs=[
            rows((B * V, out_dim)),
            rows((B * E, out_dim)),
        ],
    )

    out_v_flat, out_e_flat = pl.pallas_call(
        functools.partial(_gnn_kernel, residual),
        out_shape=(jax.ShapeDtypeStruct((N * V, out_dim), f32),
                   jax.ShapeDtypeStruct((N * E, out_dim), f32)),
        grid_spec=grid_spec,
        compiler_params=pltpu.CompilerParams(
            dimension_semantics=("parallel",),
            vmem_limit_bytes=vmem_limit),
    )(x_flat, v_flat, e_flat, M_big,
      w1, b1, w2, b2, wsn, bsn, wse, bse)

    return (out_v_flat.reshape(N, V, out_dim),
            out_e_flat.reshape(N, E, out_dim))


def gnn_layer_reference(v, e, G, A, params, *, residual=True):
    """Pure-JAX reference mirroring the PyTorch forward."""
    N, V, _ = v.shape
    out_dim = params["w2n"].shape[1]
    x = jnp.concatenate([v[:, G[:, 0], :], v[:, G[:, 1], :], e], axis=-1)

    def mlp(t, w1, b1, w2, b2):
        return jnp.maximum(t @ w1 + b1, 0.0) @ w2 + b2

    y = mlp(x, params["w1n"], params["b1n"], params["w2n"], params["b2n"])
    upd_v = jnp.zeros((N, V, out_dim), jnp.float32).at[:, G[:, 1], :].add(y)
    deg = jnp.maximum(A.sum(axis=0), 1.0)
    upd_v = upd_v / deg[None, :, None]
    upd_e = mlp(x, params["w1e"], params["b1e"], params["w2e"], params["b2e"])
    if residual:
        upd_v = upd_v + v @ params["wsn"] + params["bsn"]
        upd_e = upd_e + e @ params["wse"] + params["bse"]
    return jnp.maximum(upd_v, 0.0), jnp.maximum(upd_e, 0.0)


if __name__ == "__main__":
    N, V, E = 8, 8, 12
    node_dim, edge_dim, out_dim = 16, 8, 32
    d_in = 2 * node_dim + edge_dim

    key = jax.random.PRNGKey(0)
    keys = jax.random.split(key, 12)

    v = jax.random.normal(keys[0], (N, V, node_dim), jnp.float32)
    e = jax.random.normal(keys[1], (N, E, edge_dim), jnp.float32)

    # deterministic edge list (source, target) and matching adjacency
    G = jnp.stack([jnp.arange(E) % V, (3 * jnp.arange(E) + 1) % V], axis=1).astype(jnp.int32)
    A = jnp.zeros((V, V), jnp.float32).at[G[:, 0], G[:, 1]].set(1.0)

    def init_linear(k, fan_in, fan_out):
        kw, kb = jax.random.split(k)
        w = jax.random.normal(kw, (fan_in, fan_out), jnp.float32) * 0.1
        b = jax.random.normal(kb, (1, fan_out), jnp.float32) * 0.1
        return w, b

    params = {}
    params["w1n"], params["b1n"] = init_linear(keys[2], d_in, out_dim)
    params["w2n"], params["b2n"] = init_linear(keys[3], out_dim, out_dim)
    params["w1e"], params["b1e"] = init_linear(keys[4], d_in, out_dim)
    params["w2e"], params["b2e"] = init_linear(keys[5], out_dim, out_dim)
    params["wsn"], params["bsn"] = init_linear(keys[6], node_dim, out_dim)   # shortcut_node
    params["wse"], params["bse"] = init_linear(keys[7], edge_dim, out_dim)   # shortcut_edge

    ref_v, ref_e = gnn_layer_reference(v, e, G, A, params, residual=True)

    # f32 MXU operands: tight check against the pure-JAX reference.
    out_v, out_e = gnn_layer_forward(v, e, G, A, params, residual=True,
                                     mxu_dtype=jnp.float32)
    jax.block_until_ready((out_v, out_e))
    np.testing.assert_allclose(np.asarray(out_v), np.asarray(ref_v), rtol=2e-5, atol=2e-5)
    np.testing.assert_allclose(np.asarray(out_e), np.asarray(ref_e), rtol=2e-5, atol=2e-5)

    # bf16 MXU operands (v6e/v7x recommendation), f32 accumulate/elementwise: loose check.
    out_v16, out_e16 = gnn_layer_forward(v, e, G, A, params, residual=True,
                                         mxu_dtype=jnp.bfloat16)
    jax.block_until_ready((out_v16, out_e16))
    np.testing.assert_allclose(np.asarray(out_v16), np.asarray(ref_v), rtol=6e-2, atol=6e-2)
    np.testing.assert_allclose(np.asarray(out_e16), np.asarray(ref_e), rtol=6e-2, atol=6e-2)

    print("KERNEL_OK")
</pallas_src>

<mosaic_0001>
module attributes {stable_mosaic.version = 11 : i64} {
  func.func @_gnn_kernel(%arg0: i32, %arg1: memref<48x40xf32, #tpu.memory_space<vmem>>, %arg2: memref<32x16xf32, #tpu.memory_space<vmem>>, %arg3: memref<48x8xf32, #tpu.memory_space<vmem>>, %arg4: memref<32x48xf32, #tpu.memory_space<vmem>>, %arg5: memref<40x64xf32, #tpu.memory_space<vmem>>, %arg6: memref<1x64xf32, #tpu.memory_space<vmem>>, %arg7: memref<64x64xf32, #tpu.memory_space<vmem>>, %arg8: memref<1x64xf32, #tpu.memory_space<vmem>>, %arg9: memref<16x32xf32, #tpu.memory_space<vmem>>, %arg10: memref<1x32xf32, #tpu.memory_space<vmem>>, %arg11: memref<8x32xf32, #tpu.memory_space<vmem>>, %arg12: memref<1x32xf32, #tpu.memory_space<vmem>>, %arg13: memref<32x32xf32, #tpu.memory_space<vmem>>, %arg14: memref<48x32xf32, #tpu.memory_space<vmem>>) attributes {dimension_semantics = [#tpu.dimension_semantics<parallel>], iteration_bounds = array<i64: 2>, scalar_prefetch = 0 : i64, scratch_operands = 0 : i64, tpu.core_type = #tpu.core_type<tc>, window_params = [{transform_indices = @transform_0, window_bounds = array<i64: 48, 40>}, {transform_indices = @transform_1, window_bounds = array<i64: 32, 16>}, {transform_indices = @transform_2, window_bounds = array<i64: 48, 8>}, {pipeline_mode = #tpu.pipeline_mode<synchronous>, transform_indices = @transform_3, window_bounds = array<i64: 32, 48>}, {pipeline_mode = #tpu.pipeline_mode<synchronous>, transform_indices = @transform_4, window_bounds = array<i64: 40, 64>}, {pipeline_mode = #tpu.pipeline_mode<synchronous>, transform_indices = @transform_5, window_bounds = array<i64: 1, 64>}, {pipeline_mode = #tpu.pipeline_mode<synchronous>, transform_indices = @transform_6, window_bounds = array<i64: 64, 64>}, {pipeline_mode = #tpu.pipeline_mode<synchronous>, transform_indices = @transform_7, window_bounds = array<i64: 1, 64>}, {pipeline_mode = #tpu.pipeline_mode<synchronous>, transform_indices = @transform_8, window_bounds = array<i64: 16, 32>}, {pipeline_mode = #tpu.pipeline_mode<synchronous>, transform_indices = @transform_9, window_bounds = array<i64: 1, 32>}, {pipeline_mode = #tpu.pipeline_mode<synchronous>, transform_indices = @transform_10, window_bounds = array<i64: 8, 32>}, {pipeline_mode = #tpu.pipeline_mode<synchronous>, transform_indices = @transform_11, window_bounds = array<i64: 1, 32>}, {transform_indices = @transform_12, window_bounds = array<i64: 32, 32>}, {transform_indices = @transform_13, window_bounds = array<i64: 48, 32>}]} {
    %c0 = arith.constant 0 : index
    %c0_0 = arith.constant 0 : index
    %0 = vector.load %arg1[%c0, %c0_0] : memref<48x40xf32, #tpu.memory_space<vmem>>, vector<48x40xf32>
    %c0_1 = arith.constant 0 : index
    %c0_2 = arith.constant 0 : index
    %1 = vector.load %arg5[%c0_1, %c0_2] : memref<40x64xf32, #tpu.memory_space<vmem>>, vector<40x64xf32>
    %cst = arith.constant dense<0.000000e+00> : vector<48x64xf32>
    %2 = tpu.matmul %0, %1, %cst {dimension_numbers = #tpu.dot_dimension_numbers<[1], [0], [0], [1], [0, 0, 1, 1], [], []>} : vector<48x40xf32>, vector<40x64xf32>, vector<48x64xf32> -> vector<48x64xf32>
    %c0_3 = arith.constant 0 : index
    %c0_4 = arith.constant 0 : index
    %3 = vector.load %arg6[%c0_3, %c0_4] : memref<1x64xf32, #tpu.memory_space<vmem>>, vector<1x64xf32>
    %4 = vector.broadcast %3 : vector<1x64xf32> to vector<48x64xf32>
    %5 = arith.addf %2, %4 : vector<48x64xf32>
    %cst_5 = arith.constant 0.000000e+00 : f32
    %6 = vector.broadcast %cst_5 : f32 to vector<48x64xf32>
    %7 = arith.maximumf %5, %6 : vector<48x64xf32>
    %c0_6 = arith.constant 0 : index
    %c0_7 = arith.constant 0 : index
    %8 = vector.load %arg7[%c0_6, %c0_7] : memref<64x64xf32, #tpu.memory_space<vmem>>, vector<64x64xf32>
    %cst_8 = arith.constant dense<0.000000e+00> : vector<48x64xf32>
    %9 = tpu.matmul %7, %8, %cst_8 {dimension_numbers = #tpu.dot_dimension_numbers<[1], [0], [0], [1], [0, 0, 1, 1], [], []>} : vector<48x64xf32>, vector<64x64xf32>, vector<48x64xf32> -> vector<48x64xf32>
    %c0_9 = arith.constant 0 : index
    %c0_10 = arith.constant 0 : index
    %10 = vector.load %arg8[%c0_9, %c0_10] : memref<1x64xf32, #tpu.memory_space<vmem>>, vector<1x64xf32>
    %11 = vector.broadcast %10 : vector<1x64xf32> to vector<48x64xf32>
    %12 = arith.addf %9, %11 : vector<48x64xf32>
    %13 = vector.extract_strided_slice %12 {offsets = [0, 0], sizes = [48, 32], strides = [1, 1]} : vector<48x64xf32> to vector<48x32xf32>
    %14 = vector.extract_strided_slice %12 {offsets = [0, 32], sizes = [48, 32], strides = [1, 1]} : vector<48x64xf32> to vector<48x32xf32>
    %c0_11 = arith.constant 0 : index
    %c0_12 = arith.constant 0 : index
    %15 = vector.load %arg4[%c0_11, %c0_12] : memref<32x48xf32, #tpu.memory_space<vmem>>, vector<32x48xf32>
    %cst_13 = arith.constant dense<0.000000e+00> : vector<32x32xf32>
    %16 = tpu.matmul %15, %13, %cst_13 {dimension_numbers = #tpu.dot_dimension_numbers<[1], [0], [0], [1], [0, 0, 1, 1], [], []>} : vector<32x48xf32>, vector<48x32xf32>, vector<32x32xf32> -> vector<32x32xf32>
    %c0_14 = arith.constant 0 : index
    %c0_15 = arith.constant 0 : index
    %17 = vector.load %arg2[%c0_14, %c0_15] : memref<32x16xf32, #tpu.memory_space<vmem>>, vector<32x16xf32>
    %c0_16 = arith.constant 0 : index
    %c0_17 = arith.constant 0 : index
    %18 = vector.load %arg9[%c0_16, %c0_17] : memref<16x32xf32, #tpu.memory_space<vmem>>, vector<16x32xf32>
    %cst_18 = arith.constant dense<0.000000e+00> : vector<32x32xf32>
    %19 = tpu.matmul %17, %18, %cst_18 {dimension_numbers = #tpu.dot_dimension_numbers<[1], [0], [0], [1], [0, 0, 1, 1], [], []>} : vector<32x16xf32>, vector<16x32xf32>, vector<32x32xf32> -> vector<32x32xf32>
    %20 = arith.addf %16, %19 : vector<32x32xf32>
    %c0_19 = arith.constant 0 : index
    %c0_20 = arith.constant 0 : index
    %21 = vector.load %arg10[%c0_19, %c0_20] : memref<1x32xf32, #tpu.memory_space<vmem>>, vector<1x32xf32>
    %22 = vector.broadcast %21 : vector<1x32xf32> to vector<32x32xf32>
    %23 = arith.addf %20, %22 : vector<32x32xf32>
    %c0_21 = arith.constant 0 : index
    %c0_22 = arith.constant 0 : index
    %24 = vector.load %arg3[%c0_21, %c0_22] : memref<48x8xf32, #tpu.memory_space<vmem>>, vector<48x8xf32>
    %c0_23 = arith.constant 0 : index
    %c0_24 = arith.constant 0 : index
    %25 = vector.load %arg11[%c0_23, %c0_24] : memref<8x32xf32, #tpu.memory_space<vmem>>, vector<8x32xf32>
    %cst_25 = arith.constant dense<0.000000e+00> : vector<48x32xf32>
    %26 = tpu.matmul %24, %25, %cst_25 {dimension_numbers = #tpu.dot_dimension_numbers<[1], [0], [0], [1], [0, 0, 1, 1], [], []>} : vector<48x8xf32>, vector<8x32xf32>, vector<48x32xf32> -> vector<48x32xf32>
    %27 = arith.addf %14, %26 : vector<48x32xf32>
    %c0_26 = arith.constant 0 : index
    %c0_27 = arith.constant 0 : index
    %28 = vector.load %arg12[%c0_26, %c0_27] : memref<1x32xf32, #tpu.memory_space<vmem>>, vector<1x32xf32>
    %29 = vector.broadcast %28 : vector<1x32xf32> to vector<48x32xf32>
    %30 = arith.addf %27, %29 : vector<48x32xf32>
    %cst_28 = arith.constant 0.000000e+00 : f32
    %31 = vector.broadcast %cst_28 : f32 to vector<32x32xf32>
    %32 = arith.maximumf %23, %31 : vector<32x32xf32>
    %c0_29 = arith.constant 0 : index
    %c0_30 = arith.constant 0 : index
    %33 = vector.load %arg13[%c0_29, %c0_30] : memref<32x32xf32, #tpu.memory_space<vmem>>, vector<32x32xf32>
    tpu.vector_store %arg13[%c0_29, %c0_30], %32 {strides = array<i32>} : memref<32x32xf32, #tpu.memory_space<vmem>>, vector<32x32xf32>,
    %cst_31 = arith.constant 0.000000e+00 : f32
    %34 = vector.broadcast %cst_31 : f32 to vector<48x32xf32>
    %35 = arith.maximumf %30, %34 : vector<48x32xf32>
    %c0_32 = arith.constant 0 : index
    %c0_33 = arith.constant 0 : index
    %36 = vector.load %arg14[%c0_32, %c0_33] : memref<48x32xf32, #tpu.memory_space<vmem>>, vector<48x32xf32>
    tpu.vector_store %arg14[%c0_32, %c0_33], %35 {strides = array<i32>} : memref<48x32xf32, #tpu.memory_space<vmem>>, vector<48x32xf32>,
    return
  }
  func.func @transform_0(%arg0: i32) -> (i32, i32) {
    %c0_i32 = arith.constant 0 : i32
    %c0_i32_0 = arith.constant 0 : i32
    return %arg0, %c0_i32 : i32, i32
  }
  func.func @transform_1(%arg0: i32) -> (i32, i32) {
    %c0_i32 = arith.constant 0 : i32
    %c0_i32_0 = arith.constant 0 : i32
    return %arg0, %c0_i32 : i32, i32
  }
  func.func @transform_2(%arg0: i32) -> (i32, i32) {
    %c0_i32 = arith.constant 0 : i32
    %c0_i32_0 = arith.constant 0 : i32
    return %arg0, %c0_i32 : i32, i32
  }
  func.func @transform_3(%arg0: i32) -> (i32, i32) {
    %c0_i32 = arith.constant 0 : i32
    %c0_i32_0 = arith.constant 0 : i32
    %c0_i32_1 = arith.constant 0 : i32
    return %c0_i32, %c0_i32_0 : i32, i32
  }
  func.func @transform_4(%arg0: i32) -> (i32, i32) {
    %c0_i32 = arith.constant 0 : i32
    %c0_i32_0 = arith.constant 0 : i32
    %c0_i32_1 = arith.constant 0 : i32
    return %c0_i32, %c0_i32_0 : i32, i32
  }
  func.func @transform_5(%arg0: i32) -> (i32, i32) {
    %c0_i32 = arith.constant 0 : i32
    %c0_i32_0 = arith.constant 0 : i32
    %c0_i32_1 = arith.constant 0 : i32
    return %c0_i32, %c0_i32_0 : i32, i32
  }
  func.func @transform_6(%arg0: i32) -> (i32, i32) {
    %c0_i32 = arith.constant 0 : i32
    %c0_i32_0 = arith.constant 0 : i32
    %c0_i32_1 = arith.constant 0 : i32
    return %c0_i32, %c0_i32_0 : i32, i32
  }
  func.func @transform_7(%arg0: i32) -> (i32, i32) {
    %c0_i32 = arith.constant 0 : i32
    %c0_i32_0 = arith.constant 0 : i32
    %c0_i32_1 = arith.constant 0 : i32
    return %c0_i32, %c0_i32_0 : i32, i32
  }
  func.func @transform_8(%arg0: i32) -> (i32, i32) {
    %c0_i32 = arith.constant 0 : i32
    %c0_i32_0 = arith.constant 0 : i32
    %c0_i32_1 = arith.constant 0 : i32
    return %c0_i32, %c0_i32_0 : i32, i32
  }
  func.func @transform_9(%arg0: i32) -> (i32, i32) {
    %c0_i32 = arith.constant 0 : i32
    %c0_i32_0 = arith.constant 0 : i32
    %c0_i32_1 = arith.constant 0 : i32
    return %c0_i32, %c0_i32_0 : i32, i32
  }
  func.func @transform_10(%arg0: i32) -> (i32, i32) {
    %c0_i32 = arith.constant 0 : i32
    %c0_i32_0 = arith.constant 0 : i32
    %c0_i32_1 = arith.constant 0 : i32
    return %c0_i32, %c0_i32_0 : i32, i32
  }
  func.func @transform_11(%arg0: i32) -> (i32, i32) {
    %c0_i32 = arith.constant 0 : i32
    %c0_i32_0 = arith.constant 0 : i32
    %c0_i32_1 = arith.constant 0 : i32
    return %c0_i32, %c0_i32_0 : i32, i32
  }
  func.func @transform_12(%arg0: i32) -> (i32, i32) {
    %c0_i32 = arith.constant 0 : i32
    %c0_i32_0 = arith.constant 0 : i32
    return %arg0, %c0_i32 : i32, i32
  }
  func.func @transform_13(%arg0: i32) -> (i32, i32) {
    %c0_i32 = arith.constant 0 : i32
    %c0_i32_0 = arith.constant 0 : i32
    return %arg0, %c0_i32 : i32, i32
  }
}

</mosaic_0001>

<bundles_post_ra>
// kernel: tpu_custom_call.1
= control target key start
LH: loop header
LB: loop body
LE: loop exit
PB: predicated region body
PF: predicated region fallthrough
CT: control target
= control target key end

     0   :  { %s1576_s25 = smov 0   ;;  %s1725_s0 = inlined_call_operand.vmem [shape: f32[96,40], index: 0, kind: input, shape index: {}]   ;;  %s1726_s1 = inlined_call_operand.vmem [shape: f32[64,16], index: 1, kind: input, shape index: {}]   ;;  %s1727_s2 = inlined_call_operand.vmem [shape: f32[96,8], index: 2, kind: input, shape index: {}]   ;;  %s1728_s3 = inlined_call_operand.vmem [shape: f32[32,48], index: 3, kind: input, shape index: {}]   ;;  %s1729_s4 = inlined_call_operand.vmem [shape: f32[40,64], index: 4, kind: input, shape index: {}]   ;;  %s1730_s5 = inlined_call_operand.vmem [shape: f32[1,64], index: 5, kind: input, shape index: {}]   ;;  %s1731_s6 = inlined_call_operand.vmem [shape: f32[64,64], index: 6, kind: input, shape index: {}]   ;;  %s1732_s7 = inlined_call_operand.vmem [shape: f32[1,64], index: 7, kind: input, shape index: {}]   ;;  %s1733_s8 = inlined_call_operand.vmem [shape: f32[16,32], index: 8, kind: input, shape index: {}]   ;;  %s1734_s9 = inlined_call_operand.vmem [shape: f32[1,32], index: 9, kind: input, shape index: {}]   ;;  %s1735_s10 = inlined_call_operand.vmem [shape: f32[8,32], index: 10, kind: input, shape index: {}]   ;;  %s1736_s11 = inlined_call_operand.vmem [shape: f32[1,32], index: 11, kind: input, shape index: {}]   ;;  %s1737_s12 = inlined_call_operand.vmem [shape: f32[64,32], index: 12, kind: output, shape index: {0}]   ;;  %s1738_s13 = inlined_call_operand.vmem [shape: f32[96,32], index: 13, kind: output, shape index: {1}]  }
   0x1 LB: > { %s1311_s26 = sadd.s32 4294967295, %s1502_s25   ;;  %p1315_p0 = scmp.ge.s32.totalorder %s1502_s25, 1  ;;  %s1502_s25 = sphi %s1576_s25, %s24_s25  }
   0x2   : > { %p413_p1 = scmp.lt.s32.totalorder %s1502_s25, 3 }
   0x4   : > { %p414_p2 = pnand %p1315_p0, %p413_p1 }
   0x5   : > { %s472_s14 = smul.u32 (!%p414_p2), 6, %s1311_s26  ;;  %s1317_s15 = sshll.u32 (!%p414_p2), %s1311_s26, 2 }
   0x6   : > { %417 = sbr.rel (%p414_p2) target bundleno = 643 (0x283), region = 68  ;;  %p479_p3 = scmp.lt.s32.totalorder (!%p414_p2), %s1317_s15, 7 }
   0x7   : > { %p473_p4 = scmp.lt.s32.totalorder (!%p414_p2), %s472_s14, 11  ;;  %s1504_s16 = smov (!%p414_p2), 32  }
   0x8   : > { %s1505_s22 = smov (!%p414_p2), 96  }
   0xb   : > { %v512_v0 = vld [vmem:[%s1729_s4 + $0x20] sm:$0xff]  ;;  %v511_v1 = vld [vmem:[%s1729_s4 + $0x18] sm:$0xff]  ;;  %v510_v2 = vld [vmem:[%s1729_s4 + $0x10] sm:$0xff]  ;;  %s1740_s14 = smov (!%p473_p4, %s472_s14), 11  ;;  %s1742_s15 = smov (!%p479_p3, %s1317_s15), 7  ;;  %vm520_vm0 = vcmask 326656  }
   0xc   : > { %1403 = vmatprep.subr.mxu0 %v512_v0  ;;  %v647_v3 = vld [vmem:[%s1731_s6 + $0x38] sm:$0xff]  ;;  %v646_v4 = vld [vmem:[%s1731_s6 + $0x30] sm:$0xff]  ;;  %v509_v5 = vld [vmem:[%s1729_s4 + $0x8] sm:$0xff]  ;;  %s1611_s29 = sshll.u32 %s1740_s14, 3  ;;  %s1318_s23 = sshll.u32 %s1742_s15, 3  ;;  %vm779_vm1 = vcmask 130048  }
   0xd   : > { %1404 = vmatpush3.msra.mxu0 %v512_v0  ;;  %1422 = vmatprep.subr.mxu1 %v647_v3  ;;  %v645_v6 = vld [vmem:[%s1731_s6 + $0x28] sm:$0xff]  ;;  %v508_v7 = vld [vmem:[%s1729_s4] sm:$0xff]  ;;  %s476_s17 = scalar_lea.vmem %s1725_s0, %s1611_s29  ;;  %s482_s30 = scalar_lea.vmem %s1726_s1, %s1318_s23  ;;  %vm993_vm2 = vcmask 64512   ;;  %v643_v28 = vld [vmem:[%s1731_s6 + $0x18] sm:$0xff]  ;;  %vm655_vm3 = vcmask 523264   ;;  %vm877_vm4 = vcmask 392192  }
   0xe   : > { %1405 = vmatprep.subr.mxu0 %v511_v1  ;;  %1423 = vmatpush3.msra.mxu1 %v647_v3  ;;  %v644_v8 = vld [vmem:[%s1731_s6 + $0x20] sm:$0xff]  ;;  %v503_v10 = vld [vmem:[%s476_s17 + $0x8] sm:$0xff]  ;;  %v504_v12 = vld [vmem:[%s476_s17 + $0x10] sm:$0xff]  ;;  %s488_s19 = scalar_lea.vmem %s1727_s2, %s1611_s29  ;;  %vm1156_vm5 = vcmask 261120  }
   0xf   : > { %1406 = vmatpush3.msra.mxu0 %v511_v1  ;;  %1424 = vmatprep.subr.mxu1 %v646_v4  ;;  %v502_v9 = vld [vmem:[%s476_s17] sm:$0xff]  ;;  %v778_v11 = vld [vmem:[%s1733_s8 + $0x8] sm:$0xff]  ;;  %v505_v14 = vld [vmem:[%s476_s17 + $0x18] sm:$0xff] }
  0x10   : > { %1407 = vmatprep.subr.mxu0 %v510_v2  ;;  %1425 = vmatpush3.msra.mxu1 %v646_v4  ;;  %v777_v13 = vld [vmem:[%s1733_s8] sm:$0xff]  ;;  %v507_v17 = vld [vmem:[%s476_s17 + $0x28] sm:$0xff]  ;;  %v775_v20 = vld [vmem:[%s482_s30 + $0x10] sm:$0xff] }
  0x11   : > { %1408 = vmatpush3.msra.mxu0 %v510_v2  ;;  %1426 = vmatprep.subr.mxu1 %v645_v6  ;;  %v992_v15 = vld [vmem:[%s1735_s10] sm:$0xff]  ;;  %v774_v19 = vld [vmem:[%s482_s30 + $0x8] sm:$0xff]  ;;  %v776_v21 = vld [vmem:[%s482_s30 + $0x18] sm:$0xff] }
  0x12   : > { %1409 = vmatprep.subr.mxu0 %v509_v5  ;;  %1427 = vmatpush3.msra.mxu1 %v645_v6  ;;  %v506_v16 = vld [vmem:[%s476_s17 + $0x20] sm:$0xff]  ;;  %v987_v23 = vld [vmem:[%s488_s19 + $0x8] sm:$0xff]  ;;  %v988_v24 = vld [vmem:[%s488_s19 + $0x10] sm:$0xff]  ;;  %s500_s17 = scalar_lea.vmem %s1738_s13, %s1611_s29 }
  0x13   : > { %1410 = vmatpush3.msra.mxu0 %v509_v5  ;;  %1413 = vmatprep.mubr.msk.f32.mxu0 %vm520_vm0, %v502_v9  ;;  %v773_v18 = vld [vmem:[%s482_s30] sm:$0xff]  ;;  %v989_v25 = vld [vmem:[%s488_s19 + $0x18] sm:$0xff]  ;;  %v991_v27 = vld [vmem:[%s488_s19 + $0x28] sm:$0xff] }
  0x14   : > { %1411 = vmatprep.subr.mxu0 %v508_v7  ;;  %1428 = vmatprep.subr.mxu1 %v644_v8  ;;  %v986_v22 = vld [vmem:[%s488_s19] sm:$0xff]  ;;  %v642_v29 = vld [vmem:[%s1731_s6 + $0x10] sm:$0xff]  ;;  %v641_v30 = vld [vmem:[%s1731_s6 + $0x8] sm:$0xff] }
  0x15   : > { %1412 = vmatpush3.msra.mxu0 %v508_v7  ;;  %1429 = vmatpush3.msra.mxu1 %v644_v8  ;;  %v990_v26 = vld [vmem:[%s488_s19 + $0x20] sm:$0xff] }
  0x16   : > { %1414 = vmatmul.mubr.msk.f32.vlgmr.msra.gmra.mxu0 %vm520_vm0, %v503_v10  ;;  %1447 = vmatprep.subr.mxu0 %v778_v11  ;;  %v640_v31 = vld [vmem:[%s1731_s6] sm:$0xff] }
  0x17   : > { %1416 = vmatprep.mubr.msk.f32.mxu0 %vm520_vm0, %v504_v12  ;;  %1448 = vmatpush3.msra.mxu0 %v778_v11  ;;  %v1323_v32 = vld [vmem:[%s1730_s5] ss:$0 sm:$0xff] }
  0x18   : > { %1449 = vmatprep.subr.mxu0 %v777_v13  ;;  %1430 = vmatprep.subr.mxu1 %v643_v28  ;;  %v1352_v61 = vld [vmem:[%s1736_s11] ss:$0 sm:$0xff] }
  0x19   : > { %1450 = vmatpush3.msra.mxu0 %v777_v13  ;;  %1431 = vmatpush3.msra.mxu1 %v643_v28  ;;  %v769_v62 = vld [vmem:[%s1728_s3] sm:$0xff] }
  0x1a   : > { %1417 = vmatmul.mubr.msk.f32.gmra.mxu0 %vm520_vm0, %v505_v14  ;;  %1475 = vmatprep.subr.mxu0 %v992_v15  ;;  %v1330_v3 = vld [vmem:[%s1732_s7] ss:$0 sm:$0xff] }
  0x1b   : > { %1419 = vmatprep.mubr.msk.f32.mxu0 %vm520_vm0, %v506_v16  ;;  %1432 = vmatprep.subr.mxu1 %v642_v29 }
  0x1c   : > { %1433 = vmatpush3.msra.mxu1 %v642_v29 }
  0x1d   : > { %1434 = vmatprep.subr.mxu1 %v641_v30 }
  0x1e   : > { %1420 = vmatmul.mubr.msk.f32.gmra.mxu0 %vm520_vm0, %v507_v17  ;;  %1435 = vmatpush3.msra.mxu1 %v641_v30 }
  0x1f   : > { %1451 = vmatprep.mubr.msk.f32.mxu0 %vm779_vm1, %v773_v18  ;;  %1436 = vmatprep.subr.mxu1 %v640_v31 }
  0x20   : > { %1437 = vmatpush3.msra.mxu1 %v640_v31 }
  0x22   : > { %1452 = vmatmul.mubr.msk.f32.vlgmr.msra.gmra.mxu0 %vm779_vm1, %v774_v19 }
  0x23   : > { %1454 = vmatprep.mubr.msk.f32.mxu0 %vm779_vm1, %v775_v20  ;;  %1476 = vmatpush3.msra.mxu0 %v992_v15 }
  0x26   : > { %1455 = vmatmul.mubr.msk.f32.gmra.mxu0 %vm779_vm1, %v776_v21 }
  0x27   : > { %1477 = vmatprep.mubr.msk.f32.mxu0 %vm993_vm2, %v986_v22 }
  0x2a   : > { %1478 = vmatmul.mubr.msk.f32.vlgmr.msra.gmra.mxu0 %vm993_vm2, %v987_v23 }
  0x2b   : > { %1480 = vmatprep.mubr.msk.f32.mxu0 %vm993_vm2, %v988_v24 }
  0x2e   : > { %1481 = vmatmul.mubr.msk.f32.gmra.mxu0 %vm993_vm2, %v989_v25 }
  0x2f   : > { %1483 = vmatprep.mubr.msk.f32.mxu0 %vm993_vm2, %v990_v26 }
  0x32   : > { %1484 = vmatmul.mubr.msk.f32.gmra.mxu0 %vm993_vm2, %v991_v27 }
  0xd6   : > { %v1415_v33 = vpop.f32.mrf.mxu0 }
  0xd7   : > { %v611_v34 = vadd.f32 %v1415_v33, %v1323_v32 }
  0xd8   : > { %v605_v35 = vpop.f32.mrf.mxu0 }
  0xd9   : > { %v606_v36 = vadd.f32 %v1323_v32, %v605_v35  ;;  %v635_v39 = vmax.f32 %v611_v34, 0.0 }
  0xda   : > { %v1418_v37 = vpop.f32.mrf.mxu0 }
  0xdb   : > { %v634_v38 = vmax.f32 %v606_v36, 0.0  ;;  %v621_v40 = vadd.f32 %v1418_v37, %v1323_v32  ;;  %v770_v37 = vld [vmem:[%s1728_s3 + $0x8] sm:$0xff] }
  0xdc   : > { %v615_v41 = vpop.f32.mrf.mxu0 }
  0xdd   : > { %v616_v42 = vadd.f32 %v1323_v32, %v615_v41  ;;  %1438 = vmatprep.mubr.msk.f32.mxu1 %vm655_vm3, %v634_v38  ;;  %v637_v45 = vmax.f32 %v621_v40, 0.0  ;;  %v771_v38 = vld [vmem:[%s1728_s3 + $0x10] sm:$0xff] }
  0xde   : > { %v1421_v43 = vpop.f32.mrf.mxu0  ;;  %1439 = vmatmul.mubr.msk.f32.vlgmr.msra.gmra.mxu1 %vm655_vm3, %v635_v39  ;;  %v772_v39 = vld [vmem:[%s1728_s3 + $0x18] sm:$0xff] }
  0xdf   : > { %v636_v44 = vmax.f32 %v616_v42, 0.0  ;;  %v631_v46 = vadd.f32 %v1421_v43, %v1323_v32 }
  0xe0   : > { %v625_v47 = vpop.f32.mrf.mxu0 }
  0xe1   : > { %v626_v48 = vadd.f32 %v1323_v32, %v625_v47  ;;  %1441 = vmatprep.mubr.msk.f32.mxu1 %vm655_vm3, %v636_v44  ;;  %v639_v51 = vmax.f32 %v631_v46, 0.0 }
  0xe2   : > { %1442 = vmatmul.mubr.msk.f32.gmra.mxu1 %vm655_vm3, %v637_v45  ;;  %v1664_v49 = vpop.f32.mrf.mxu0 }
  0xe3   : > { %v638_v50 = vmax.f32 %v626_v48, 0.0  ;;  %v1345_v48 = vld [vmem:[%s1734_s9] ss:$0 sm:$0xff] }
  0xe4   : > { %v1666_v52 = vpop.f32.mrf.mxu0 }
  0xe5   : > { %1444 = vmatprep.mubr.msk.f32.mxu1 %vm655_vm3, %v638_v50 }
  0xe6   : > { %1445 = vmatmul.mubr.msk.f32.gmra.mxu1 %vm655_vm3, %v639_v51  ;;  %v1670_v53 = vpop.f32.mrf.mxu0 }
  0xe7   : > { %1469 = vmatprep.mubr.msk.f32.mxu1 %vm877_vm4, %v769_v62 }
  0xe8   : > { %v1672_v54 = vpop.f32.mrf.mxu0 }
  0xea   : > { %v1479_v55 = vpop.f32.mrf.mxu0 }
  0xeb   : > { %1115 = vrot.lane.b32.xlu0 %v1479_v55, %s1504_s16 }
  0xec   : > { %v1078_v56 = vpop.f32.mrf.mxu0 }
  0xee   : > { %v1482_v57 = vpop.f32.mrf.mxu0 }
  0xef   : > { %1113 = vrot.lane.b32.xlu0 %v1078_v56, %s1504_s16  ;;  %1119 = vrot.lane.b32.xlu1 %v1482_v57, %s1504_s16 }
  0xf0   : > { %v1088_v58 = vpop.f32.mrf.mxu0 }
  0xf2   : > { %v1485_v59 = vpop.f32.mrf.mxu0 }
  0xf3   : > { %1117 = vrot.lane.b32.xlu1 %v1088_v58, %s1504_s16 }
  0xf4   : > { %v1098_v60 = vpop.f32.mrf.mxu0 }
  0xf5   : > { %1121 = vrot.lane.b32.xlu0 %v1098_v60, %s1504_s16 }
  0xf7   : > { %1123 = vrot.lane.b32.xlu1 %v1485_v59, %s1504_s16 }
  0xf9   : > { %1143 = vrot.lane.b32.xlu0 %v1352_v61, %s1504_s16 }
 0x15d   : > { %v1116_v63 = vpop.permute.xlu0 %1115 }
 0x161   : > { %v1114_v0 = vpop.permute.xlu0 %1113  ;;  %v1120_v1 = vpop.permute.xlu1 %1119 }
 0x165   : > { %v1118_v6 = vpop.permute.xlu1 %1117 }
 0x167   : > { %v1122_v2 = vpop.permute.xlu0 %1121 }
 0x169   : > { %v1124_v21 = vpop.permute.xlu1 %1123 }
 0x16b   : > { %v1144_v8 = vpop.permute.xlu0 %1143 }
 0x19e   : > { %v1440_v4 = vpop.f32.mrf.mxu1 }
 0x19f   : > { %v746_v5 = vadd.f32 %v1440_v4, %v1330_v3 }
 0x1a0   : > { %v740_v7 = vpop.f32.mrf.mxu1 }
 0x1a1   : > { %v1132_v9 = vadd.f32 %v1116_v63, %v746_v5  ;;  %v741_v10 = vadd.f32 %v1330_v3, %v740_v7 }
 0x1a2   : > { %v1443_v11 = vpop.f32.mrf.mxu1 }
 0x1a3   : > { %v1131_v12 = vadd.f32 %v1114_v0, %v741_v10  ;;  %v756_v13 = vadd.f32 %v1443_v11, %v1330_v3  ;;  %v1147_v14 = vadd.f32 %v1144_v8, %v1132_v9 }
 0x1a4   : > { %v750_v15 = vpop.f32.mrf.mxu1 }
 0x1a5   : > { %v1134_v16 = vadd.f32 %v1120_v1, %v756_v13  ;;  %v751_v17 = vadd.f32 %v1330_v3, %v750_v15  ;;  %v1162_v18 = vmax.f32 %v1147_v14, 0.0  ;;  %v1146_v19 = vadd.f32 %v1144_v8, %v1131_v12 }
 0x1a6   : > { %v1446_v20 = vpop.f32.mrf.mxu1 }
 0x1a7   : > { %v1133_v22 = vadd.f32 %v1118_v6, %v751_v17  ;;  %v766_v23 = vadd.f32 %v1446_v20, %v1330_v3  ;;  %1175 = vrot.lane.b32.xlu0 %v1162_v18, %s1505_s22  ;;  %v1161_v24 = vmax.f32 %v1146_v19, 0.0  ;;  %v1149_v25 = vadd.f32 %v1144_v8, %v1134_v16 }
 0x1a8   : > { %v760_v26 = vpop.f32.mrf.mxu1 }
 0x1a9   : > { %v1136_v27 = vadd.f32 %v1124_v21, %v766_v23  ;;  %v761_v28 = vadd.f32 %v1330_v3, %v760_v26  ;;  %1457 = vmatprep.subr.mxu1 %v766_v23  ;;  %1173 = vrot.lane.b32.xlu1 %v1161_v24, %s1505_s22  ;;  %v1164_v29 = vmax.f32 %v1149_v25, 0.0  ;;  %v1148_v30 = vadd.f32 %v1144_v8, %v1133_v22 }
 0x1aa   : > { %1458 = vmatpush3.msra.mxu1 %v766_v23 }
 0x1ab   : > { %v1151_v31 = vadd.f32 %v1144_v8, %v1136_v27  ;;  %v1135_v32 = vadd.f32 %v1122_v2, %v761_v28  ;;  %1179 = vrot.lane.b32.xlu0 %v1164_v29, %s1505_s22  ;;  %1459 = vmatprep.subr.mxu1 %v761_v28  ;;  %v1163_v33 = vmax.f32 %v1148_v30, 0.0 }
 0x1ac   : > { %1460 = vmatpush3.msra.mxu1 %v761_v28 }
 0x1ad   : > { %v1166_v34 = vmax.f32 %v1151_v31, 0.0  ;;  %1461 = vmatprep.subr.mxu1 %v756_v13  ;;  %1177 = vrot.lane.b32.xlu1 %v1163_v33, %s1505_s22  ;;  %v1150_v35 = vadd.f32 %v1144_v8, %v1135_v32 }
 0x1ae   : > { %1462 = vmatpush3.msra.mxu1 %v756_v13 }
 0x1af   : > { %1183 = vrot.lane.b32.xlu0 %v1166_v34, %s1505_s22  ;;  %1463 = vmatprep.subr.mxu1 %v751_v17  ;;  %v1165_v36 = vmax.f32 %v1150_v35, 0.0 }
 0x1b0   : > { %1464 = vmatpush3.msra.mxu1 %v751_v17 }
 0x1b1   : > { %1465 = vmatprep.subr.mxu1 %v746_v5  ;;  %1181 = vrot.lane.b32.xlu1 %v1165_v36, %s1505_s22  ;;  %s494_s22 = scalar_lea.vmem %s1737_s12, %s1318_s23 }
 0x1b2   : > { %1466 = vmatpush3.msra.mxu1 %v746_v5 }
 0x1b3   : > { %1467 = vmatprep.subr.mxu1 %v741_v10 }
 0x1b4   : > { %1468 = vmatpush3.msra.mxu1 %v741_v10 }
 0x1b5   : > { %1470 = vmatmul.mubr.msk.f32.vlgmr.msra.gmra.mxu1 %vm877_vm4, %v770_v37 }
 0x1b6   : > { %1472 = vmatprep.mubr.msk.f32.mxu1 %vm877_vm4, %v771_v38 }
 0x1b9   : > { %1473 = vmatmul.mubr.msk.f32.gmra.mxu1 %vm877_vm4, %v772_v39 }
 0x219   : > { %v1176_v40 = vpop.permute.xlu0 %1175 }
 0x21a   : > { %1192 = vst.msk [vmem:[%s500_s17 + $0x8] sm:$0xff] %vm1156_vm5, %v1176_v40 }
 0x21b   : > { %v1174_v41 = vpop.permute.xlu1 %1173 }
 0x21c   : > { %1191 = vst.msk [vmem:[%s500_s17] sm:$0xff] %vm1156_vm5, %v1174_v41 }
 0x21d   : > { %v1180_v42 = vpop.permute.xlu0 %1179 }
 0x21e   : > { %1194 = vst.msk [vmem:[%s500_s17 + $0x18] sm:$0xff] %vm1156_vm5, %v1180_v42 }
 0x21f   : > { %v1178_v43 = vpop.permute.xlu1 %1177 }
 0x220   : > { %1193 = vst.msk [vmem:[%s500_s17 + $0x10] sm:$0xff] %vm1156_vm5, %v1178_v43 }
 0x221   : > { %v1184_v44 = vpop.permute.xlu0 %1183 }
 0x222   : > { %1196 = vst.msk [vmem:[%s500_s17 + $0x28] sm:$0xff] %vm1156_vm5, %v1184_v44 }
 0x223   : > { %v1182_v45 = vpop.permute.xlu1 %1181 }
 0x224   : > { %1195 = vst.msk [vmem:[%s500_s17 + $0x20] sm:$0xff] %vm1156_vm5, %v1182_v45 }
 0x275   : > { %v1471_v46 = vpop.f32.mrf.mxu1 }
 0x276   : > { %v962_v47 = vadd.f32 %v1471_v46, %v1664_v49 }
 0x277   : > { %v956_v50 = vpop.f32.mrf.mxu1 }
 0x278   : > { %v957_v51 = vadd.f32 %v956_v50, %v1666_v52  ;;  %v983_v55 = vadd.f32 %v1345_v48, %v962_v47 }
 0x279   : > { %v1474_v56 = vpop.f32.mrf.mxu1 }
 0x27a   : > { %v982_v57 = vadd.f32 %v1345_v48, %v957_v51  ;;  %v972_v58 = vadd.f32 %v1474_v56, %v1670_v53  ;;  %v1153_v61 = vmax.f32 %v983_v55, 0.0 }
 0x27b   : > { %v966_v59 = vpop.f32.mrf.mxu1 }
 0x27c   : > { %v1152_v60 = vmax.f32 %v982_v57, 0.0  ;;  %v967_v49 = vadd.f32 %v966_v59, %v1672_v54  ;;  %v985_v62 = vadd.f32 %v1345_v48, %v972_v58  ;;  %1158 = vst.msk [vmem:[%s494_s22 + $0x8] sm:$0xff] %vm1156_vm5, %v1153_v61 }
 0x27e   : > { %1157 = vst.msk [vmem:[%s494_s22] sm:$0xff] %vm1156_vm5, %v1152_v60  ;;  %v984_v63 = vadd.f32 %v1345_v48, %v967_v49  ;;  %v1155_v0 = vmax.f32 %v985_v62, 0.0 }
 0x280   : > { %v1154_v52 = vmax.f32 %v984_v63, 0.0  ;;  %1160 = vst.msk [vmem:[%s494_s22 + $0x18] sm:$0xff] %vm1156_vm5, %v1155_v0 }
 0x282   : > { %1159 = vst.msk [vmem:[%s494_s22 + $0x10] sm:$0xff] %vm1156_vm5, %v1154_v52 }
 0x283 PF: > { %s24_s25 = sadd.s32 1, %s1502_s25  }
 0x284   : > { %p21_p5 = scmp.ge.s32.totalorder %s24_s25, 4  }
 0x286   :  { %23 = sbr.rel (!%p21_p5) target bundleno = 1 (0x1), region = 116 }

</bundles_post_ra>
